<compile_context>
chip_gen: v7x
topology: tpu7x:2x2x1
jax: 0.10.0
libtpu: 0.0.40
codegen_flags: <defaults>
</compile_context>

<pallas_src>
from dataclasses import dataclass

import jax
import jax.numpy as jnp
from jax.experimental import pallas as pl
from jax.experimental.pallas import tpu as pltpu


@dataclass
class ModulationOut:
    shift: jnp.ndarray
    scale: jnp.ndarray
    gate: jnp.ndarray


def _modulation_kernel(x_ref, w_ref, b_ref, o_ref):
    """One N tile:  o = silu(x) @ W_tile + b_tile  (f32 accumulation)."""
    tn = o_ref.shape[-1]
    # SiLU in f32 on the VPU/EUP. x is tiny (B x dim), so recomputing it per
    # N tile is essentially free and avoids a scratch that would break under
    # "parallel" (megacore) grid sharding.
    x = x_ref[...].astype(jnp.float32)
    sx = x * jax.nn.sigmoid(x)
    # Feed the MXU in the weight's native dtype (no f32 upcast of the weight
    # stream); accumulate in f32.
    y = jnp.dot(sx.astype(w_ref.dtype), w_ref[...],
                preferred_element_type=jnp.float32)
    # Bias is VMEM-resident (fetched once); slice the current tile in-kernel
    # instead of paying a tiny per-step DMA + semaphore wait.
    if b_ref.shape[-1] == tn:
        b = b_ref[...]
    else:
        start = pl.multiple_of(pl.program_id(0) * tn, tn)
        b = b_ref[:, pl.ds(start, tn)]
    y = y + b.astype(jnp.float32)
    o_ref[...] = y.astype(o_ref.dtype)


def _vmem_capacity_bytes() -> int:
    """Per-TensorCore VMEM capacity (128 MiB v5e/v6e, 64 MiB v7x)."""
    try:
        return int(pltpu.get_tpu_info().vmem_capacity_bytes)
    except Exception:
        return 64 << 20  # conservative default (v7x per-TC)


def _choose_tn(dim, out_dim, w_bytes, target_tile_bytes):
    """Largest multiple-of-128 N tile whose weight slab is ~target bytes."""
    if out_dim % 128 != 0:
        # Toy / irregular sizes: full-extent block (still legal per TPU rules).
        return out_dim
    tn = (target_tile_bytes // max(dim * w_bytes, 1)) // 128 * 128
    return int(max(128, min(tn, out_dim)))


def _weight_spec(dim, tn, buffers, pretiled):
    """Weight BlockSpec; returns (spec, actual_buffer_count) so VMEM budgeting
    matches even if the pipeline_mode kwarg is unavailable (old jax)."""
    if pretiled:
        block, imap = (None, dim, tn), (lambda j: (j, 0, 0))
    else:
        block, imap = (dim, tn), (lambda j: (0, j))
    try:
        return pl.BlockSpec(block, imap,
                            pipeline_mode=pl.Buffered(buffers)), buffers
    except TypeError:  # older jax without pipeline_mode kwarg -> default 2-deep
        return pl.BlockSpec(block, imap), 2


def prepare_modulation_weight(w_t, tn):
    """Pre-tile (dim, out_dim) -> (n_tiles, dim, tn) so every weight DMA is one
    fully contiguous dim*tn*w_bytes stream (instead of `dim` strided segments).
    Call once at weight-load time, not per forward pass."""
    dim, out_dim = w_t.shape
    n_tiles = pl.cdiv(out_dim, tn)
    pad = n_tiles * tn - out_dim
    if pad:
        w_t = jnp.pad(w_t, ((0, 0), (0, pad)))
    return jnp.transpose(w_t.reshape(dim, n_tiles, tn), (1, 0, 2))


def modulation_forward(vec, w, bias, *, double: bool, tn: int | None = None):
    """Flux Modulation forward.

    vec : (B, dim)
    w   : (dim, mult*dim) pre-transposed Linear weight, OR a pre-tiled
          (n_tiles, dim, tn) array from prepare_modulation_weight().
    bias: (mult*dim,)

    Contract: if `tn` does not divide mult*dim the last tile is a padded,
    write-masked partial tile (correct, slightly less efficient).
    """
    B, dim = vec.shape
    mult = 6 if double else 3
    out_dim = mult * dim
    assert bias.shape == (out_dim,)

    # Weight dtype guard: the activation is cast to the weight dtype before the
    # MXU — fine for f32/bf16/f16, silently wrong for quantized int8/fp8
    # weights (no scale handling), so reject those.
    assert (jnp.issubdtype(w.dtype, jnp.floating)
            and jnp.dtype(w.dtype).itemsize >= 2), (
        "modulation_forward: quantized weights need dequant/scale handling")

    w_bytes = jnp.dtype(w.dtype).itemsize
    x_bytes = jnp.dtype(vec.dtype).itemsize
    b_bytes = jnp.dtype(bias.dtype).itemsize
    out_bytes = x_bytes  # output dtype == vec dtype

    # Per-generation VMEM budget. 3-deep weight buffering where VMEM is
    # plentiful (v5e/v6e 128 MiB); 2-deep + equally big slabs on v7x's 64 MiB
    # (same back-to-back DMA behavior at half the footprint).
    vmem_cap = _vmem_capacity_bytes()
    buffers = 3 if vmem_cap >= (96 << 20) else 2

    pretiled = (w.ndim == 3)
    if pretiled:
        n_tiles, wdim, wtn = w.shape
        assert wdim == dim and n_tiles * wtn >= out_dim
        tn = wtn
    else:
        assert w.shape == (dim, out_dim)
        if tn is None:
            # ~16 MiB weight slabs: halves/quarters the grid-step count vs the
            # old 4 MiB heuristic and lengthens each contiguous DMA segment.
            target = max(8 << 20, min(16 << 20, (vmem_cap // 2) // buffers))
            tn = _choose_tn(dim, out_dim, w_bytes, target)
            # Clamp so buffers*slab + residents + out stays inside physical VMEM.
            budget = vmem_cap - (16 << 20)
            tn_cap = max(128, (budget // max(buffers * dim * w_bytes, 1))
                         // 128 * 128)
            tn = int(min(tn, tn_cap))
        n_tiles = pl.cdiv(out_dim, tn)

    # Bias: keep resident in VMEM, padded so the in-kernel tile slice is always
    # in bounds even for a partial last tile.
    padded_n = n_tiles * tn
    b2d = bias.reshape(1, out_dim)
    if padded_n != out_dim:
        b2d = jnp.pad(b2d, ((0, 0), (0, padded_n - out_dim)))

    # Bandwidth-heavy custom call: weight stream dominates bytes_accessed.
    cost = pl.CostEstimate(
        flops=2 * B * dim * out_dim,
        transcendentals=B * dim * n_tiles,       # sigmoid recomputed per N tile
        bytes_accessed=(dim * out_dim * w_bytes  # weight streamed once
                        + B * dim * x_bytes      # x fetched once (resident)
                        + padded_n * b_bytes     # bias fetched once (resident)
                        + B * out_dim * out_bytes),
    )

    w_spec, buffers = _weight_spec(dim, tn, buffers, pretiled)

    # VMEM: `buffers` weight slabs + resident x/bias + double-buffered output.
    vmem_needed = (buffers * dim * tn * w_bytes
                   + B * dim * x_bytes
                   + padded_n * b_bytes
                   + 2 * B * tn * out_bytes)
    # Clamp to physical VMEM (minus headroom) so a user-picked huge tn cannot
    # request more than the chip has (v7x is 64 MiB per TC, not 128).
    vmem_limit = int(min(max(vmem_needed + (4 << 20), 32 << 20),
                         vmem_cap - (8 << 20)))

    out = pl.pallas_call(
        _modulation_kernel,
        out_shape=jax.ShapeDtypeStruct((B, out_dim), vec.dtype),
        grid_spec=pltpu.PrefetchScalarGridSpec(
            num_scalar_prefetch=0,
            grid=(n_tiles,),
            in_specs=[
                pl.BlockSpec((B, dim), lambda j: (0, 0)),       # x: resident
                w_spec,                                         # W: streamed
                pl.BlockSpec((1, padded_n), lambda j: (0, 0)),  # bias: resident
            ],
            out_specs=pl.BlockSpec((B, tn), lambda j: (0, j)),
        ),
        compiler_params=pltpu.CompilerParams(
            # N tiles are independent -> shard the weight stream across v7x's
            # two TensorCores (no cost on v5e/v6e).
            # TODO(synk): if profiling on v7x shows one TC issuing all DMAs,
            # switch to pltpu.CORE_PARALLEL / a core_map split of the N axis.
            dimension_semantics=("parallel",),
            vmem_limit_bytes=vmem_limit,
        ),
        cost_estimate=cost,
    )(vec, w, b2d)

    # out[:, None, :].chunk(multiplier, dim=-1) -> mult tensors of (B, 1, dim)
    out = out[:, None, :]
    chunks = [out[:, :, i * dim:(i + 1) * dim] for i in range(mult)]
    first = ModulationOut(*chunks[:3])
    second = ModulationOut(*chunks[3:6]) if double else None
    return first, second
    # TODO(synk): when called once per transformer block with the same vec,
    # stack per-layer weights into (L, dim, out_dim) and add a leading
    # "arbitrary" grid axis so one pallas_call streams all Flux blocks and
    # amortizes launch / pipeline fill-drain across layers.


if __name__ == "__main__":
    # Small but lane-aligned shapes so the tiled (grid=(3,)) path is exercised.
    B, dim = 2, 128
    mult = 6
    out_dim = mult * dim  # 768

    key = jax.random.PRNGKey(0)
    k_vec, k_w, k_b = jax.random.split(key, 3)

    vec = jax.random.normal(k_vec, (B, dim), dtype=jnp.float32)
    # PyTorch Linear stores weight as (mult*dim, dim); we keep it pre-transposed.
    w_t = jax.random.normal(k_w, (dim, out_dim), dtype=jnp.float32) * 0.02
    bias = jax.random.normal(k_b, (out_dim,), dtype=jnp.float32) * 0.02

    # Reference in plain JAX.
    ref = jax.nn.silu(vec) @ w_t + bias
    ref = ref[:, None, :]
    ref_chunks = [ref[:, :, i * dim:(i + 1) * dim] for i in range(mult)]

    # (a) Streamed (dim, out_dim) weight, explicit small tn -> 3 grid steps.
    m1, m2 = modulation_forward(vec, w_t, bias, double=True, tn=256)
    jax.block_until_ready(m1.shift)
    jax.block_until_ready(m2.gate)
    got = [m1.shift, m1.scale, m1.gate, m2.shift, m2.scale, m2.gate]
    for g, r in zip(got, ref_chunks):
        assert g.shape == (B, 1, dim)
        assert jnp.allclose(g, r, atol=1e-4, rtol=1e-4), \
            float(jnp.max(jnp.abs(g - r)))

    # (b) Pre-tiled contiguous weight path (one contiguous DMA per tile).
    w_pre = prepare_modulation_weight(w_t, 256)
    p1, p2 = modulation_forward(vec, w_pre, bias, double=True)
    jax.block_until_ready(p1.shift)
    for g, r in zip([p1.shift, p1.scale, p1.gate,
                     p2.shift, p2.scale, p2.gate], ref_chunks):
        assert jnp.allclose(g, r, atol=1e-4, rtol=1e-4)

    # (c) bf16 weights: silu(x) cast to bf16 before the MXU, f32 accumulation.
    m1b, m2b = modulation_forward(vec.astype(jnp.bfloat16),
                                  w_t.astype(jnp.bfloat16),
                                  bias.astype(jnp.bfloat16),
                                  double=True, tn=256)
    jax.block_until_ready(m1b.shift)
    assert jnp.allclose(m1b.shift.astype(jnp.float32), ref_chunks[0],
                        atol=5e-2, rtol=5e-2)

    # (d) Single (double=False) path with auto TN selection (single tile).
    w_t3 = w_t[:, : 3 * dim]
    b3 = bias[: 3 * dim]
    s1, s2 = modulation_forward(vec, w_t3, b3, double=False)
    jax.block_until_ready(s1.gate)
    assert s2 is None
    ref3 = (jax.nn.silu(vec) @ w_t3 + b3)[:, None, :]
    assert jnp.allclose(s1.shift, ref3[:, :, :dim], atol=1e-4, rtol=1e-4)

    print("KERNEL_OK")
</pallas_src>

<mosaic_0001>
module attributes {stable_mosaic.version = 11 : i64} {
  func.func @_modulation_kernel(%arg0: i32, %arg1: memref<2x128xf32, #tpu.memory_space<vmem>>, %arg2: memref<128x256xf32, #tpu.memory_space<vmem>>, %arg3: memref<1x768xf32, #tpu.memory_space<vmem>>, %arg4: memref<2x256xf32, #tpu.memory_space<vmem>>) attributes {dimension_semantics = [#tpu.dimension_semantics<parallel>], iteration_bounds = array<i64: 3>, scalar_prefetch = 0 : i64, scratch_operands = 0 : i64, tpu.core_type = #tpu.core_type<tc>, window_params = [{pipeline_mode = #tpu.pipeline_mode<synchronous>, transform_indices = @transform_0, window_bounds = array<i64: 2, 128>}, {pipeline_mode = #tpu.pipeline_mode<double_buffered>, transform_indices = @transform_1, window_bounds = array<i64: 128, 256>}, {pipeline_mode = #tpu.pipeline_mode<synchronous>, transform_indices = @transform_2, window_bounds = array<i64: 1, 768>}, {transform_indices = @transform_3, window_bounds = array<i64: 2, 256>}]} {
    %c0 = arith.constant 0 : index
    %c0_0 = arith.constant 0 : index
    %0 = vector.load %arg1[%c0, %c0_0] : memref<2x128xf32, #tpu.memory_space<vmem>>, vector<2x128xf32>
    %1 = arith.negf %0 : vector<2x128xf32>
    %2 = math.exp %1 : vector<2x128xf32>
    %cst = arith.constant 1.000000e+00 : f32
    %3 = vector.broadcast %cst : f32 to vector<2x128xf32>
    %4 = arith.addf %3, %2 : vector<2x128xf32>
    %5 = arith.divf %3, %4 : vector<2x128xf32>
    %6 = arith.mulf %0, %5 : vector<2x128xf32>
    %c0_1 = arith.constant 0 : index
    %c0_2 = arith.constant 0 : index
    %7 = vector.load %arg2[%c0_1, %c0_2] : memref<128x256xf32, #tpu.memory_space<vmem>>, vector<128x256xf32>
    %cst_3 = arith.constant dense<0.000000e+00> : vector<2x256xf32>
    %8 = tpu.matmul %6, %7, %cst_3 {dimension_numbers = #tpu.dot_dimension_numbers<[1], [0], [0], [1], [0, 0, 1, 1], [], []>} : vector<2x128xf32>, vector<128x256xf32>, vector<2x256xf32> -> vector<2x256xf32>
    %c256_i32 = arith.constant 256 : i32
    %9 = arith.muli %arg0, %c256_i32 : i32
    %10 = tpu.assume_multiple %9, 256 : i32
    %c0_4 = arith.constant 0 : index
    %11 = arith.index_cast %10 : i32 to index
    %12 = vector.load %arg3[%c0_4, %11] : memref<1x768xf32, #tpu.memory_space<vmem>>, vector<1x256xf32>
    %13 = vector.broadcast %12 : vector<1x256xf32> to vector<2x256xf32>
    %14 = arith.addf %8, %13 : vector<2x256xf32>
    %c0_5 = arith.constant 0 : index
    %c0_6 = arith.constant 0 : index
    %15 = vector.load %arg4[%c0_5, %c0_6] : memref<2x256xf32, #tpu.memory_space<vmem>>, vector<2x256xf32>
    tpu.vector_store %arg4[%c0_5, %c0_6], %14 {strides = array<i32>} : memref<2x256xf32, #tpu.memory_space<vmem>>, vector<2x256xf32>,
    return
  }
  func.func @transform_0(%arg0: i32) -> (i32, i32) {
    %c0_i32 = arith.constant 0 : i32
    %c0_i32_0 = arith.constant 0 : i32
    %c0_i32_1 = arith.constant 0 : i32
    return %c0_i32, %c0_i32_0 : i32, i32
  }
  func.func @transform_1(%arg0: i32) -> (i32, i32) {
    %c0_i32 = arith.constant 0 : i32
    %c0_i32_0 = arith.constant 0 : i32
    return %c0_i32, %arg0 : i32, i32
  }
  func.func @transform_2(%arg0: i32) -> (i32, i32) {
    %c0_i32 = arith.constant 0 : i32
    %c0_i32_0 = arith.constant 0 : i32
    %c0_i32_1 = arith.constant 0 : i32
    return %c0_i32, %c0_i32_0 : i32, i32
  }
  func.func @transform_3(%arg0: i32) -> (i32, i32) {
    %c0_i32 = arith.constant 0 : i32
    %c0_i32_0 = arith.constant 0 : i32
    return %c0_i32, %arg0 : i32, i32
  }
}

</mosaic_0001>

<bundles_post_ra>
// kernel: tpu_custom_call.1
= control target key start
LH: loop header
LB: loop body
LE: loop exit
PB: predicated region body
PF: predicated region fallthrough
CT: control target
= control target key end

     0   :  { %8 = vsyncpa [#allocation3], 0  ;;  %s949_s0 = inlined_call_operand.hbm [shape: f32[2,128], index: 0, kind: input, shape index: {}]   ;;  %s950_s1 = inlined_call_operand.hbm [shape: f32[128,768], index: 1, kind: input, shape index: {}]   ;;  %s951_s2 = inlined_call_operand.vmem [shape: f32[1,768], index: 2, kind: input, shape index: {}]   ;;  %s952_s3 = inlined_call_operand.hbm [shape: f32[2,768], index: 3, kind: output, shape index: {}]  }
   0x1   :  { %9 = vsyncpa [#allocation6], 0 }
   0x2   :  { %11 = vsyncpa [#allocation6 + $0x1], 0 }
   0x3   :  { %12 = vsyncpa [#allocation4], 0 }
   0x4   :  { %14 = vsyncpa [#allocation4 + $0x1], 0  ;;  %s716_s12 = smov 0   ;;  %s718_s13 = smov 0  }
   0x5   :  { %s720_s14 = smov 0   ;;  %s722_s15 = smov 0  }
   0x6 LB: > { %s737_s16 = sadd.s32 4294967295, %s687_s15   ;;  %s441_s17 = sadd.s32 4294967294, %s687_s15   ;;  %s687_s15 = sphi %s722_s15, %s975_s15   ;;  %s683_s14 = sphi %s720_s14, %s974_s14   ;;  %s679_s13 = sphi %s718_s13, %s973_s13   ;;  %s675_s12 = sphi %s716_s12, %s972_s12  }
   0x7   : > { %s741_s18 = sadd.s32 1, %s687_s15   ;;  %s48_s19 = sadd.s32 1, %s683_s14 }
   0x8   : > { %s45_s20 = ssub.s32 %s687_s15, %s741_s18  ;;  %p55_p0 = scmp.ne.s32.totalorder %s683_s14, %s679_s13 }
   0x9   : > { %p46_p1 = scmp.eq.s32.totalorder %s45_s20, 0  ;;  %p56_p2 = scmp.eq.s32.totalorder %s687_s15, 0 }
   0xa   : > { %p61_p3 = scmp.ne.s32.totalorder %s679_s13, %s675_s12  ;;  %p953_p4 = scmp.eq.s32.totalorder %s737_s16, 0 }
   0xb   : > { %s753_s21 = scalar_select %p46_p1, %s683_s14, %s48_s19  }
   0xc   : > { %p755_p5 = por %p56_p2, %p55_p0  ;;  %p761_p6 = por %p953_p4, %p61_p3 }
   0xd   : > { %p106_p7 = scmp.eq.s32.totalorder %s737_s16, 2  ;;  %p112_p8 = scmp.eq.s32.totalorder %s441_s17, 2 }
   0xe   : > { %s959_s23 = scalar_select %p761_p6, 1, 0 }
   0xf   : > { %p442_p9 = scmp.ge.s32.totalorder %s687_s15, 1  ;;  %p119_p10 = scmp.lt.s32.totalorder %s687_s15, 4 }
  0x10   : > { %p768_p11 = por %p106_p7, %p55_p0  ;;  %p772_p12 = por %p112_p8, %p61_p3 }
  0x11   : > { %p776_p13 = pnand %p442_p9, %p119_p10  ;;  %s689_s27 = smov [#allocation2]  }
  0x12   : > { %s960_s24 = scalar_select %p768_p11, 1, 0 }
  0x13   : > { %s961_s25 = scalar_select %p772_p12, 1, 0 }
  0x14   : > { %s962_s26 = scalar_select %p776_p13, 1, 0 }
  0x15   : > { %p502_p1 = pneg %p776_p13  ;;  %s132_s28 = sshll.u32 %s689_s27, 4  ;;  %s133_s28 = int_to_ptr.vmem [resolvable:$true] %s132_s28 }
  0x16   : > { %p515_p2 = scmp.lt.s32.totalorder %s687_s15, 3  ;;  %s146_s30 = sand.u32 1, %s683_s14  }
  0x17   : > { %p785_p0 = pnand %p502_p1, %p953_p4  ;;  %s445_s5 = sshll.u32 %s146_s30, 8 }
  0x18   : > { %p792_p3 = pnand %p515_p2, %p755_p5  ;;  %s559_s8 = scalar_lea.hbm %s949_s0, 32 }
  0x19   : > { %p560_p7 = scmp.ne.s32.totalorder %s949_s0, %s559_s8  ;;  %p561_p8 = pneg %p785_p0 }
  0x1a   : > { %s964_s4 = scalar_select %p792_p3, 1, 0 }
  0x1b   : > { %p562_p9 = pnand %p561_p8, %p560_p7  ;;  %p566_p5 = scmp.lt.u32.totalorder %s559_s8, %s949_s0 }
  0x1d   : > { %p563_p10 = pneg %p562_p9 }
  0x1f   : > { %p568_p1 = pnand %p566_p5, %p563_p10 }
  0x21   : > { %571 = shalt.err (!%p568_p1)
}
  0x22   : > { %s572_s19 = scalar_lea.vmem %s133_s28, 32  ;;  %p580_p11 = scmp.lt.s32.totalorder %s133_s28, %s133_s28 }
  0x23   : > { %p573_p2 = scmp.ne.s32.totalorder %s133_s28, %s572_s19  ;;  %p581_p6 = scmp.lt.s32.totalorder %s572_s19, %s572_s19 }
  0x25   : > { %p575_p4 = pnand %p573_p2, %p561_p8  ;;  %p582_p13 = por %p581_p6, %p580_p11 }
  0x27   : > { %p576_p12 = pneg %p575_p4 }
  0x29   : > { %p583_p3 = pnand %p582_p13, %p576_p12 }
  0x2b   : > { %586 = shalt.err (!%p583_p3)
}
  0x2c   : > { %505 = dma.hbm_to_vmem [thread:$0]  (!%p785_p0), %s949_s0, 32, %s133_s28, [#allocation3]  }
  0x2d   : > { %s460_s27 = sshll.u32 %s687_s15, 8  ;;  %s150_s6 = scalar_lea.vmem [#allocation5], %s445_s5 }
  0x2e   : > { %s157_s7 = sshll.u32 %s150_s6, 4  ;;  %s816_s10 = scalar_lea.hbm %s950_s1, %s460_s27  ;;  %s818_s7 = int_to_ptr.vmem [resolvable:$true] %s157_s7 }
  0x2f   : > { %s820_s29 = scalar_lea.sflag [#allocation6], %s146_s30  ;;  %s587_s11 = scalar_lea.hbm %s816_s10, 4096 }
  0x30   : > { %p588_p4 = scmp.ne.s32.totalorder %s816_s10, %s587_s11  ;;  %p965_p6 = scmp.ne.s32.totalorder %s964_s4, 0 }
  0x31   : > { %s592_s17 = scalar_lea.hbm %s950_s1, 12288  ;;  %p593_p0 = scmp.lt.u32.totalorder %s816_s10, %s950_s1 }
  0x32   : > { %p589_p11 = pneg %p965_p6  ;;  %p594_p3 = scmp.lt.u32.totalorder %s592_s17, %s587_s11 }
  0x33   : > { %p596_p8 = scmp.lt.u32.totalorder %s587_s11, %s816_s10 }
  0x34   : > { %p590_p12 = pnand %p589_p11, %p588_p4  ;;  %p595_p7 = por %p594_p3, %p593_p0 }
  0x36   : > { %p591_p13 = pneg %p590_p12  ;;  %p597_p9 = por %p596_p8, %p595_p7 }
  0x38   : > { %p598_p10 = pnand %p597_p9, %p591_p13 }
  0x3a   : > { %601 = shalt.err (!%p598_p10)
}
  0x3b   : > { %s602_s30 = scalar_lea.vmem %s818_s7, 4096  ;;  %s690_s22 = smov [#allocation5]  }
  0x3c   : > { %p603_p5 = scmp.ne.s32.totalorder %s818_s7, %s602_s30  ;;  %s607_s27 = sshll.u32 %s690_s22, 4  ;;  %s608_s27 = int_to_ptr.vmem [resolvable:$false] %s607_s27 }
  0x3d   : > { %s609_s6 = scalar_lea.vmem %s608_s27, 8192  ;;  %p610_p4 = scmp.lt.s32.totalorder %s818_s7, %s608_s27 }
  0x3e   : > { %p605_p1 = pnand %p603_p5, %p589_p11  ;;  %p611_p12 = scmp.lt.s32.totalorder %s609_s6, %s602_s30 }
  0x40   : > { %p606_p2 = pneg %p605_p1  ;;  %p612_p0 = por %p611_p12, %p610_p4 }
  0x42   : > { %p613_p3 = pnand %p612_p0, %p606_p2 }
  0x44   : > { %616 = shalt.err (!%p613_p3)
}
  0x45   : > { %s691_s8 = smov 768   ;;  %s692_s9 = smov 256  }
  0x46   : > { %s693_s11 = smov 16   ;;  %p966_p11 = scmp.ne.s32.totalorder %s962_s26, 0 }
  0x47   : > { %509 = dma.hbm_to_vmem [thread:$0]  (!%p965_p6), %s816_s10, 4096, %s818_s7, %s820_s29, %s691_s8, %s692_s9, %s693_s11  }
  0x48   : > { %169 = sbr.rel (%p966_p11) target bundleno = 351 (0x15f), region = 32  ;;  %p967_p13 = scmp.eq.s32.totalorder (!%p966_p11), %s737_s16, 0 }
  0x4f   : > { %662 = dma.done.wait (%p967_p13), [#allocation3], 32   ;;  %p968_p7 = pmov %p967_p13 }
  0x50   : > { %s855_s28 = sand.u32 1, %s679_s13   ;;  %p969_p6 = scmp.ne.s32.totalorder %s959_s23, 0 }
  0x51   : > { %664 = vsyncadd (%p968_p7), [#allocation3], 4294967264  ;;  %s450_s5 = sshll.u32 %s855_s28, 8  ;;  %s176_s17 = scalar_lea.sflag [#allocation6], %s855_s28 }
  0x52   : > { %s859_s19 = scalar_lea.vmem [#allocation5], %s450_s5 }
  0x53   : > { %666 = dma.done.wait (%p969_p6), %s176_s17, 4096  }
  0x54   : > { %668 = vsyncadd (%p969_p6), %s176_s17, 4294963200  ;;  %v694_v0 = vmov 0.0   ;;  %v213_v1 = vld [vmem:[%s859_s19 + $0x8] sm:$0xff]  ;;  %v215_v2 = vld [vmem:[%s859_s19 + $0x18] sm:$0xff]  ;;  %s453_s23 = sshll.u32 %s737_s16, 8  ;;  %v250_v55 = vlaneseq  ;;  %s451_s29 = sshll.u32 %s855_s28, 2 }
  0x55   : > { %324 = vmatprep.mubr.f32.mxu0 %v694_v0  ;;  %v212_v3 = vld [vmem:[%s859_s19] sm:$0xff]  ;;  %v462_v4 = vpack.c.bf16 %v215_v2, %v213_v1  ;;  %v214_v5 = vld [vmem:[%s859_s19 + $0x10] sm:$0xff]  ;;  %v217_v6 = vld [vmem:[%s859_s19 + $0x28] sm:$0xff]  ;;  %s245_s26 = sshra.s32 %s453_s23, 7  ;;  %s461_s20 = sshll.u32 %s737_s16, 6 }
  0x56   : > { %v219_v7 = vld [vmem:[%s859_s19 + $0x38] sm:$0xff]  ;;  %v464_v8 = vpack.c.bf16 %v214_v5, %v212_v3  ;;  %v216_v10 = vld [vmem:[%s859_s19 + $0x20] sm:$0xff]  ;;  %v218_v11 = vld [vmem:[%s859_s19 + $0x30] sm:$0xff]  ;;  %v251_v56 = vshrl.u32 %v250_v55, 7  ;;  %s247_s10 = scalar_lea.vmem %s951_s2, %s245_s26  ;;  %s201_s30 = scalar_lea.vmem [#allocation7], %s451_s29 }
  0x57   : > { %v466_v9 = vpack.c.bf16 %v219_v7, %v217_v6  ;;  %v221_v12 = vld [vmem:[%s859_s19 + $0x48] sm:$0xff]  ;;  %463 = vmatprep.subr.bf16.mxu0 %v462_v4  ;;  %v223_v13 = vld [vmem:[%s859_s19 + $0x58] sm:$0xff]  ;;  %v468_v14 = vpack.c.bf16 %v218_v11, %v216_v10  ;;  %v220_v16 = vld [vmem:[%s859_s19 + $0x40] sm:$0xff]  ;;  %s358_s22 = sshll.u32 %s201_s30, 4  ;;  %s906_s8 = scalar_lea.hbm %s952_s3, %s461_s20  ;;  %s908_s22 = int_to_ptr.vmem [resolvable:$true] %s358_s22 }
  0x58   : > { %465 = vmatpush1.bf16.msra.mxu0 %v464_v8  ;;  %v470_v15 = vpack.c.bf16 %v223_v13, %v221_v12  ;;  %v222_v17 = vld [vmem:[%s859_s19 + $0x50] sm:$0xff]  ;;  %v225_v18 = vld [vmem:[%s859_s19 + $0x68] sm:$0xff]  ;;  %v227_v19 = vld [vmem:[%s859_s19 + $0x78] sm:$0xff]  ;;  %v252_v57 = vsub.s32 0, %v251_v56  ;;  %v256_v59 = vsub.s32 1, %v251_v56  ;;  %s344_s9 = scalar_lea.sflag [#allocation4], %s855_s28 }
  0x59   : > { %467 = vmatprep.subr.bf16.mxu0 %v466_v9  ;;  %v472_v20 = vpack.c.bf16 %v222_v17, %v220_v16  ;;  %v474_v21 = vpack.c.bf16 %v227_v19, %v225_v18  ;;  %v224_v22 = vld [vmem:[%s859_s19 + $0x60] sm:$0xff]  ;;  %v226_v23 = vld [vmem:[%s859_s19 + $0x70] sm:$0xff]  ;;  %v229_v24 = vld [vmem:[%s859_s19 + $0x88] sm:$0xff]  ;;  %s617_s11 = scalar_lea.vmem %s908_s22, 64  ;;  %p970_p9 = scmp.ne.s32.totalorder %s960_s24, 0 }
  0x5a   : > { %v231_v25 = vld [vmem:[%s859_s19 + $0x98] sm:$0xff]  ;;  %v476_v28 = vpack.c.bf16 %v226_v23, %v224_v22  ;;  %v228_v30 = vld [vmem:[%s859_s19 + $0x80] sm:$0xff]  ;;  %v230_v31 = vld [vmem:[%s859_s19 + $0x90] sm:$0xff]  ;;  %p618_p8 = scmp.ne.s32.totalorder %s908_s22, %s617_s11  ;;  %s695_s16 = smov [#allocation7]  }
  0x5b   : > { %v204_v26 = vld [vmem:[#allocation2] sm:$0x3]  ;;  %v478_v29 = vpack.c.bf16 %v231_v25, %v229_v24  ;;  %v233_v32 = vld [vmem:[%s859_s19 + $0xa8] sm:$0xff]  ;;  %v480_v34 = vpack.c.bf16 %v230_v31, %v228_v30  ;;  %v232_v36 = vld [vmem:[%s859_s19 + $0xa0] sm:$0xff]  ;;  %s621_s5 = sshll.u32 %s695_s16, 4  ;;  %s622_s5 = int_to_ptr.vmem [resolvable:$false] %s621_s5 }
  0x5c   : > { %469 = vmatpush1.bf16.msra.mxu0 %v468_v14  ;;  %v452_v27 = vmul.f32 -1.442695, %v204_v26  ;;  %v235_v33 = vld [vmem:[%s859_s19 + $0xb8] sm:$0xff]  ;;  %v234_v37 = vld [vmem:[%s859_s19 + $0xb0] sm:$0xff]  ;;  %v237_v38 = vld [vmem:[%s859_s19 + $0xc8] sm:$0xff]  ;;  %p619_p10 = pnand %p618_p8, %p970_p9  ;;  %s623_s17 = scalar_lea.vmem %s622_s5, 128 }
  0x5d   : > { %471 = vmatprep.subr.bf16.mxu0 %v470_v15  ;;  %v482_v35 = vpack.c.bf16 %v235_v33, %v233_v32  ;;  %v239_v39 = vld [vmem:[%s859_s19 + $0xd8] sm:$0xff]  ;;  %v484_v40 = vpack.c.bf16 %v234_v37, %v232_v36  ;;  %v236_v42 = vld [vmem:[%s859_s19 + $0xc0] sm:$0xff]  ;;  %v238_v43 = vld [vmem:[%s859_s19 + $0xd0] sm:$0xff]  ;;  %p624_p1 = scmp.lt.s32.totalorder %s908_s22, %s622_s5  ;;  %p625_p2 = scmp.lt.s32.totalorder %s623_s17, %s617_s11 }
  0x5e   : > { %555 = vpow2.f32 %v452_v27  ;;  %v486_v41 = vpack.c.bf16 %v239_v39, %v237_v38  ;;  %v241_v44 = vld [vmem:[%s859_s19 + $0xe8] sm:$0xff]  ;;  %v243_v45 = vld [vmem:[%s859_s19 + $0xf8] sm:$0xff]  ;;  %v488_v47 = vpack.c.bf16 %v238_v43, %v236_v42  ;;  %v240_v50 = vld [vmem:[%s859_s19 + $0xe0] sm:$0xff]  ;;  %p620_p5 = pneg %p619_p10 }
  0x5f   : > { %v490_v49 = vpack.c.bf16 %v243_v45, %v241_v44  ;;  %v242_v51 = vld [vmem:[%s859_s19 + $0xf0] sm:$0xff]  ;;  %p626_p4 = por %p625_p2, %p624_p1 }
  0x60   : > { %473 = vmatpush1.bf16.msra.mxu0 %v472_v20  ;;  %v492_v52 = vpack.c.bf16 %v242_v51, %v240_v50  ;;  %v248_v58 = vld [vmem:[%s247_s10] sm:$0x3] }
  0x61   : > { %475 = vmatprep.subr.bf16.mxu0 %v474_v21  ;;  %v253_v60 = vrot.slane %v248_v58, %v252_v57  ;;  %v257_v61 = vrot.slane %v248_v58, %v256_v59  ;;  %p627_p12 = pnand %p626_p4, %p620_p5 }
  0x64   : > { %477 = vmatpush1.bf16.msra.mxu0 %v476_v28 }
  0x65   : > { %479 = vmatprep.subr.bf16.mxu0 %v478_v29 }
  0x68   : > { %481 = vmatpush1.bf16.msra.mxu0 %v480_v34  ;;  %v556_v46 = vpop.eup %555 }
  0x69   : > { %483 = vmatprep.subr.bf16.mxu0 %v482_v35  ;;  %v208_v48 = vadd.f32 1.0, %v556_v46 }
  0x6b   : > { %557 = vrcp.f32 %v208_v48 }
  0x6c   : > { %485 = vmatpush1.bf16.msra.mxu0 %v484_v40 }
  0x6d   : > { %487 = vmatprep.subr.bf16.mxu0 %v486_v41 }
  0x70   : > { %489 = vmatpush1.bf16.msra.mxu0 %v488_v47 }
  0x71   : > { %491 = vmatprep.subr.bf16.mxu0 %v490_v49 }
  0x74   : > { %493 = vmatpush1.bf16.msra.mxu0 %v492_v52 }
  0x75   : > { %v558_v53 = vpop.eup %557 }
  0x76   : > { %v211_v54 = vmul.f32 %v558_v53, %v204_v26 }
  0x78   : > { %325 = vmatmul.mubr.f32.vlgmr.msra.gmra.mrb[0].mxu0 %v211_v54 }
 0x14b   : > { %v326_v62 = vpop.f32.mrb[0].mxu0 }
 0x14c   : > { %v327_v63 = vadd.f32 %v326_v62, %v253_v60  ;;  %v328_v0 = vpop.f32.mrb[1].mxu0 }
 0x14d   : > { %v329_v1 = vadd.f32 %v328_v0, %v257_v61 }
 0x14f   : > { %v333_v2 = vcombine.low %v327_v63, %v329_v1 }
 0x151   : > { %454 = vst.sshfl [vmem:[%s201_s30] sm:$0x33 pattern:$0x76325410] %v333_v2 }
 0x152   : > { %630 = shalt.err (!%p627_p12)
}
 0x153   : > { %s631_s28 = scalar_lea.hbm %s906_s8, 64  ;;  %s635_s26 = scalar_lea.hbm %s952_s3, 192 }
 0x154   : > { %p632_p0 = scmp.ne.s32.totalorder %s906_s8, %s631_s28  ;;  %p636_p13 = scmp.lt.u32.totalorder %s906_s8, %s952_s3 }
 0x155   : > { %p637_p7 = scmp.lt.u32.totalorder %s635_s26, %s631_s28  ;;  %p639_p8 = scmp.lt.u32.totalorder %s631_s28, %s906_s8 }
 0x156   : > { %p633_p3 = pnand %p632_p0, %p970_p9 }
 0x157   : > { %p638_p6 = por %p637_p7, %p636_p13 }
 0x158   : > { %p634_p11 = pneg %p633_p3 }
 0x159   : > { %p640_p10 = por %p639_p8, %p638_p6 }
 0x15b   : > { %p641_p5 = pnand %p640_p10, %p634_p11 }
 0x15d   : > { %644 = shalt.err (!%p641_p5)
}
 0x15e   : > { %500 = dma.vmem_to_hbm [thread:$0]  (%p970_p9), %s908_s22, 64, %s906_s8, %s344_s9  }
 0x15f PF: > { %p517_p1 = scmp.ge.s32.totalorder %s687_s15, 2  ;;  %s370_s10 = sand.u32 1, %s675_s12  }
 0x160   : > { %p971_p2 = scmp.ne.s32.totalorder %s961_s25, 0  ;;  %s371_s29 = scalar_lea.sflag [#allocation4], %s370_s10 }
 0x162   : > { %p511_p4 = pnand %p517_p1, %p971_p2 }
 0x164   : > { %670 = dma.done.wait (!%p511_p4), %s371_s29, 64  }
 0x165   : > { %672 = vsyncadd (!%p511_p4), %s371_s29, 4294967232  ;;  %p17_p12 = scmp.ge.s32.totalorder %s741_s18, 5   ;;  %s972_s12 = smov %s679_s13 }
 0x166   : > { %s973_s13 = smov %s683_s14  ;;  %s974_s14 = smov %s753_s21 }
 0x167   : > { %s975_s15 = smov %s741_s18  ;;  %19 = sbr.rel (!%p17_p12) target bundleno = 6 (0x6), region = 83 }
 0x16e   :  { %376 = vsyncpa [#allocation3], 1 }
 0x16f   :  { %378 = vsyncpa [#allocation3 + $0x1], 1 }
 0x170   :  { %379 = vsyncpa [#allocation6], 1 }
 0x171   :  { %381 = vsyncpa [#allocation6 + $0x1], 1 }
 0x172   :  { %382 = vsyncpa [#allocation4], 1 }
 0x173   :  { %384 = vsyncpa [#allocation4 + $0x1], 1 }

</bundles_post_ra>
